<compile_context>
chip_gen: v6e
topology: v6e:2x2x1
jax: 0.10.0
libtpu: 0.0.40
codegen_flags: <defaults>
</compile_context>

<pallas_src>
import functools

import jax
import jax.numpy as jnp
from jax import lax
from jax.experimental import pallas as pl
from jax.experimental.pallas import tpu as pltpu


def token_mixing_kernel(xq_ref, xkv_ref, wq_ref, wk_ref, wv_ref, wp_ref,
                        bp_ref, o_ref, *, num_heads):
    xq = xq_ref[0]                    # (tq, C) bf16 — this query tile's rows
    xkv = xkv_ref[0]                  # (N,  C) bf16 — all tokens (k/v source)
    bproj = bp_ref[...]               # (1,  C) f32

    tq, C = xq.shape

    acc = jnp.zeros((tq, C), dtype=jnp.float32)
    for h in range(num_heads):        # static unroll over heads
        wq_h = wq_ref[h]              # (C, hd) bf16, qk scale pre-folded
        wk_h = wk_ref[h]              # (C, hd) bf16
        wv_h = wv_ref[h]              # (C, hd) bf16
        wp_h = wp_ref[h]              # (hd, C) bf16

        # per-head projections generated directly at lane offset 0
        qh = jnp.dot(xq, wq_h, preferred_element_type=jnp.float32).astype(jnp.bfloat16)
        kh = jnp.dot(xkv, wk_h, preferred_element_type=jnp.float32).astype(jnp.bfloat16)
        vh = jnp.dot(xkv, wv_h, preferred_element_type=jnp.float32).astype(jnp.bfloat16)

        # scores (tq, N): contract last dims directly (no explicit transpose)
        s = lax.dot_general(qh, kh, (((1,), (1,)), ((), ())),
                            preferred_element_type=jnp.float32)
        s = s - jnp.max(s, axis=-1, keepdims=True)
        p = jnp.exp(s)
        inv_l = pl.reciprocal(jnp.sum(p, axis=-1, keepdims=True), approx=True)

        # PV with unnormalized probs; normalize the narrow (tq, hd) output
        # instead of the wide (tq, N) probability matrix.
        oh = jnp.dot(p.astype(jnp.bfloat16), vh, preferred_element_type=jnp.float32)
        oh = oh * inv_l

        # fused output projection: accumulate this head's contribution to y
        acc = acc + jnp.dot(oh.astype(jnp.bfloat16), wp_h,
                            preferred_element_type=jnp.float32)

    o_ref[0] = (acc + bproj).astype(o_ref.dtype)


def _pick_query_tile(n):
    """Largest (8,128)-friendly query tile that divides N; full N if small."""
    if n <= 256:
        return n
    for t in (512, 256, 128):
        if n % t == 0:
            return t
    return n


def token_mixing(x, wq, wkv, wproj, bproj, *, num_heads):
    B, N, C = x.shape
    assert C % num_heads == 0, "dim must be divisible by num_heads"
    hd = C // num_heads
    scale = hd ** (-0.5)

    # ---- one-time host-side weight prep (torch Linear layout: (out, in)) ----
    # per-head q weights (H, C, hd) with the qk scale folded in
    wq_h = (wq * scale).reshape(num_heads, hd, C).transpose(0, 2, 1).astype(jnp.bfloat16)
    wk_h = wkv[:C].reshape(num_heads, hd, C).transpose(0, 2, 1).astype(jnp.bfloat16)
    wv_h = wkv[C:].reshape(num_heads, hd, C).transpose(0, 2, 1).astype(jnp.bfloat16)
    # per-head output-projection weights (H, hd, C): y = sum_h o_h @ wp_h[h]
    wp_h = wproj.reshape(C, num_heads, hd).transpose(1, 2, 0).astype(jnp.bfloat16)
    bproj2 = bproj.reshape(1, C).astype(jnp.float32)
    xb = x.astype(jnp.bfloat16)

    tq = _pick_query_tile(N)
    grid = (B, N // tq)

    kernel = functools.partial(token_mixing_kernel, num_heads=num_heads)

    return pl.pallas_call(
        kernel,
        out_shape=jax.ShapeDtypeStruct((B, N, C), x.dtype),
        grid_spec=pltpu.PrefetchScalarGridSpec(
            num_scalar_prefetch=0,
            grid=grid,
            in_specs=[
                pl.BlockSpec((1, tq, C), lambda b, q: (b, q, 0)),           # x (q rows)
                pl.BlockSpec((1, N, C), lambda b, q: (b, 0, 0)),            # x (k/v rows)
                pl.BlockSpec((num_heads, C, hd), lambda b, q: (0, 0, 0)),   # Wq per head
                pl.BlockSpec((num_heads, C, hd), lambda b, q: (0, 0, 0)),   # Wk per head
                pl.BlockSpec((num_heads, C, hd), lambda b, q: (0, 0, 0)),   # Wv per head
                pl.BlockSpec((num_heads, hd, C), lambda b, q: (0, 0, 0)),   # Wproj per head
                pl.BlockSpec((1, C), lambda b, q: (0, 0)),                  # bproj
            ],
            out_specs=pl.BlockSpec((1, tq, C), lambda b, q: (b, q, 0)),
        ),
        compiler_params=pltpu.CompilerParams(
            dimension_semantics=("parallel", "parallel"),
            vmem_limit_bytes=32 * 1024 * 1024,
        ),
    )(xb, xb, wq_h, wk_h, wv_h, wp_h, bproj2)


def token_mixing_ref(x, wq, wkv, wproj, bproj, *, num_heads):
    """Pure-JAX f32 reference of the PyTorch TokenMixing.forward."""
    B, N, C = x.shape
    hd = C // num_heads
    scale = hd ** (-0.5)
    q = jnp.einsum('bnc,oc->bno', x, wq).reshape(B, N, num_heads, hd)
    q = q.transpose(0, 2, 1, 3)                                    # (B,H,N,hd)
    kv = jnp.einsum('bnc,oc->bno', x, wkv).reshape(B, N, 2, num_heads, hd)
    kv = kv.transpose(2, 0, 3, 1, 4)
    k, v = kv[0], kv[1]
    attn = jnp.einsum('bhqd,bhkd->bhqk', q * scale, k)
    attn = jax.nn.softmax(attn, axis=-1)
    o = jnp.einsum('bhqk,bhkd->bhqd', attn, v)
    o = o.transpose(0, 2, 1, 3).reshape(B, N, C)
    return jnp.einsum('bnc,oc->bno', o, wproj) + bproj[None, None, :]


if __name__ == "__main__":
    B, N, C = 2, 8, 32
    num_heads = 4

    key = jax.random.PRNGKey(0)
    kx, kq, kkv, kp = jax.random.split(key, 4)

    x = jax.random.normal(kx, (B, N, C), dtype=jnp.float32)
    # trunc_normal_(std=0.02) approximated by normal(std=0.02); proj bias init'd to 0
    wq = 0.02 * jax.random.normal(kq, (C, C), dtype=jnp.float32)
    wkv = 0.02 * jax.random.normal(kkv, (2 * C, C), dtype=jnp.float32)
    wproj = 0.02 * jax.random.normal(kp, (C, C), dtype=jnp.float32)
    bproj = jnp.zeros((C,), dtype=jnp.float32)

    out = jax.block_until_ready(
        token_mixing(x, wq, wkv, wproj, bproj, num_heads=num_heads))
    ref = token_mixing_ref(x, wq, wkv, wproj, bproj, num_heads=num_heads)

    assert out.shape == (B, N, C)
    # bf16 matmul operands + approx reciprocal -> loosened tolerance vs f32 ref
    assert jnp.allclose(out, ref, atol=2e-2, rtol=2e-2), (
        f"mismatch vs reference: max abs diff {jnp.max(jnp.abs(out - ref))}")

    print("KERNEL_OK")
</pallas_src>

<mosaic_0001>
module attributes {stable_mosaic.version = 11 : i64} {
  func.func @token_mixing_kernel(%arg0: i32, %arg1: i32, %arg2: memref<1x8x32xbf16, #tpu.memory_space<vmem>>, %arg3: memref<1x8x32xbf16, #tpu.memory_space<vmem>>, %arg4: memref<4x32x8xbf16, #tpu.memory_space<vmem>>, %arg5: memref<4x32x8xbf16, #tpu.memory_space<vmem>>, %arg6: memref<4x32x8xbf16, #tpu.memory_space<vmem>>, %arg7: memref<4x8x32xbf16, #tpu.memory_space<vmem>>, %arg8: memref<1x32xf32, #tpu.memory_space<vmem>>, %arg9: memref<1x8x32xf32, #tpu.memory_space<vmem>>) attributes {dimension_semantics = [#tpu.dimension_semantics<parallel>, #tpu.dimension_semantics<parallel>], iteration_bounds = array<i64: 2, 1>, scalar_prefetch = 0 : i64, scratch_operands = 0 : i64, tpu.core_type = #tpu.core_type<tc>, window_params = [{transform_indices = @transform_0, window_bounds = array<i64: 1, 8, 32>}, {transform_indices = @transform_1, window_bounds = array<i64: 1, 8, 32>}, {pipeline_mode = #tpu.pipeline_mode<synchronous>, transform_indices = @transform_2, window_bounds = array<i64: 4, 32, 8>}, {pipeline_mode = #tpu.pipeline_mode<synchronous>, transform_indices = @transform_3, window_bounds = array<i64: 4, 32, 8>}, {pipeline_mode = #tpu.pipeline_mode<synchronous>, transform_indices = @transform_4, window_bounds = array<i64: 4, 32, 8>}, {pipeline_mode = #tpu.pipeline_mode<synchronous>, transform_indices = @transform_5, window_bounds = array<i64: 4, 8, 32>}, {pipeline_mode = #tpu.pipeline_mode<synchronous>, transform_indices = @transform_6, window_bounds = array<i64: 1, 32>}, {transform_indices = @transform_7, window_bounds = array<i64: 1, 8, 32>}]} {
    %c0 = arith.constant 0 : index
    %c0_0 = arith.constant 0 : index
    %c0_1 = arith.constant 0 : index
    %0 = vector.load %arg2[%c0, %c0_0, %c0_1] : memref<1x8x32xbf16, #tpu.memory_space<vmem>>, vector<1x8x32xbf16>
    %1 = vector.shape_cast %0 : vector<1x8x32xbf16> to vector<8x32xbf16>
    %c0_2 = arith.constant 0 : index
    %c0_3 = arith.constant 0 : index
    %c0_4 = arith.constant 0 : index
    %2 = vector.load %arg3[%c0_2, %c0_3, %c0_4] : memref<1x8x32xbf16, #tpu.memory_space<vmem>>, vector<1x8x32xbf16>
    %3 = vector.shape_cast %2 : vector<1x8x32xbf16> to vector<8x32xbf16>
    %c0_5 = arith.constant 0 : index
    %c0_6 = arith.constant 0 : index
    %4 = vector.load %arg8[%c0_5, %c0_6] : memref<1x32xf32, #tpu.memory_space<vmem>>, vector<1x32xf32>
    %cst = arith.constant 0.000000e+00 : f32
    %5 = vector.broadcast %cst : f32 to vector<8x32xf32>
    %c0_7 = arith.constant 0 : index
    %c0_8 = arith.constant 0 : index
    %c0_9 = arith.constant 0 : index
    %6 = vector.load %arg4[%c0_7, %c0_8, %c0_9] : memref<4x32x8xbf16, #tpu.memory_space<vmem>>, vector<1x32x8xbf16>
    %7 = vector.shape_cast %6 : vector<1x32x8xbf16> to vector<32x8xbf16>
    %c0_10 = arith.constant 0 : index
    %c0_11 = arith.constant 0 : index
    %c0_12 = arith.constant 0 : index
    %8 = vector.load %arg5[%c0_10, %c0_11, %c0_12] : memref<4x32x8xbf16, #tpu.memory_space<vmem>>, vector<1x32x8xbf16>
    %9 = vector.shape_cast %8 : vector<1x32x8xbf16> to vector<32x8xbf16>
    %c0_13 = arith.constant 0 : index
    %c0_14 = arith.constant 0 : index
    %c0_15 = arith.constant 0 : index
    %10 = vector.load %arg6[%c0_13, %c0_14, %c0_15] : memref<4x32x8xbf16, #tpu.memory_space<vmem>>, vector<1x32x8xbf16>
    %11 = vector.shape_cast %10 : vector<1x32x8xbf16> to vector<32x8xbf16>
    %c0_16 = arith.constant 0 : index
    %c0_17 = arith.constant 0 : index
    %c0_18 = arith.constant 0 : index
    %12 = vector.load %arg7[%c0_16, %c0_17, %c0_18] : memref<4x8x32xbf16, #tpu.memory_space<vmem>>, vector<1x8x32xbf16>
    %13 = vector.shape_cast %12 : vector<1x8x32xbf16> to vector<8x32xbf16>
    %cst_19 = arith.constant dense<0.000000e+00> : vector<8x8xf32>
    %14 = tpu.matmul %1, %7, %cst_19 {dimension_numbers = #tpu.dot_dimension_numbers<[1], [0], [0], [1], [0, 0, 1, 1], [], []>} : vector<8x32xbf16>, vector<32x8xbf16>, vector<8x8xf32> -> vector<8x8xf32>
    %15 = arith.truncf %14 : vector<8x8xf32> to vector<8x8xbf16>
    %cst_20 = arith.constant dense<0.000000e+00> : vector<8x8xf32>
    %16 = tpu.matmul %3, %9, %cst_20 {dimension_numbers = #tpu.dot_dimension_numbers<[1], [0], [0], [1], [0, 0, 1, 1], [], []>} : vector<8x32xbf16>, vector<32x8xbf16>, vector<8x8xf32> -> vector<8x8xf32>
    %17 = arith.truncf %16 : vector<8x8xf32> to vector<8x8xbf16>
    %cst_21 = arith.constant dense<0.000000e+00> : vector<8x8xf32>
    %18 = tpu.matmul %3, %11, %cst_21 {dimension_numbers = #tpu.dot_dimension_numbers<[1], [0], [0], [1], [0, 0, 1, 1], [], []>} : vector<8x32xbf16>, vector<32x8xbf16>, vector<8x8xf32> -> vector<8x8xf32>
    %19 = arith.truncf %18 : vector<8x8xf32> to vector<8x8xbf16>
    %cst_22 = arith.constant dense<0.000000e+00> : vector<8x8xf32>
    %20 = tpu.matmul %15, %17, %cst_22 {dimension_numbers = #tpu.dot_dimension_numbers<[1], [1], [0], [0], [0, 0, 1, 0], [], []>} : vector<8x8xbf16>, vector<8x8xbf16>, vector<8x8xf32> -> vector<8x8xf32>
    %cst_23 = arith.constant dense<0xFF800000> : vector<8xf32>
    %21 = vector.multi_reduction <maximumf>, %20, %cst_23 [1] : vector<8x8xf32> to vector<8xf32>
    %22 = vector.shape_cast %21 : vector<8xf32> to vector<8x1xf32>
    %23 = vector.broadcast %22 : vector<8x1xf32> to vector<8x8xf32>
    %24 = arith.subf %20, %23 : vector<8x8xf32>
    %25 = math.exp %24 : vector<8x8xf32>
    %cst_24 = arith.constant dense<0.000000e+00> : vector<8xf32>
    %26 = vector.multi_reduction <add>, %25, %cst_24 [1] : vector<8x8xf32> to vector<8xf32>
    %27 = vector.shape_cast %26 : vector<8xf32> to vector<8x1xf32>
    %28 = tpu.reciprocal %27 {approx = true} : vector<8x1xf32> -> vector<8x1xf32>
    %29 = arith.truncf %25 : vector<8x8xf32> to vector<8x8xbf16>
    %cst_25 = arith.constant dense<0.000000e+00> : vector<8x8xf32>
    %30 = tpu.matmul %29, %19, %cst_25 {dimension_numbers = #tpu.dot_dimension_numbers<[1], [0], [0], [1], [0, 0, 1, 1], [], []>} : vector<8x8xbf16>, vector<8x8xbf16>, vector<8x8xf32> -> vector<8x8xf32>
    %31 = vector.broadcast %28 : vector<8x1xf32> to vector<8x8xf32>
    %32 = arith.mulf %30, %31 : vector<8x8xf32>
    %33 = arith.truncf %32 : vector<8x8xf32> to vector<8x8xbf16>
    %cst_26 = arith.constant dense<0.000000e+00> : vector<8x32xf32>
    %34 = tpu.matmul %33, %13, %cst_26 {dimension_numbers = #tpu.dot_dimension_numbers<[1], [0], [0], [1], [0, 0, 1, 1], [], []>} : vector<8x8xbf16>, vector<8x32xbf16>, vector<8x32xf32> -> vector<8x32xf32>
    %35 = arith.addf %5, %34 : vector<8x32xf32>
    %c1 = arith.constant 1 : index
    %c0_27 = arith.constant 0 : index
    %c0_28 = arith.constant 0 : index
    %36 = vector.load %arg4[%c1, %c0_27, %c0_28] : memref<4x32x8xbf16, #tpu.memory_space<vmem>>, vector<1x32x8xbf16>
    %37 = vector.shape_cast %36 : vector<1x32x8xbf16> to vector<32x8xbf16>
    %c1_29 = arith.constant 1 : index
    %c0_30 = arith.constant 0 : index
    %c0_31 = arith.constant 0 : index
    %38 = vector.load %arg5[%c1_29, %c0_30, %c0_31] : memref<4x32x8xbf16, #tpu.memory_space<vmem>>, vector<1x32x8xbf16>
    %39 = vector.shape_cast %38 : vector<1x32x8xbf16> to vector<32x8xbf16>
    %c1_32 = arith.constant 1 : index
    %c0_33 = arith.constant 0 : index
    %c0_34 = arith.constant 0 : index
    %40 = vector.load %arg6[%c1_32, %c0_33, %c0_34] : memref<4x32x8xbf16, #tpu.memory_space<vmem>>, vector<1x32x8xbf16>
    %41 = vector.shape_cast %40 : vector<1x32x8xbf16> to vector<32x8xbf16>
    %c1_35 = arith.constant 1 : index
    %c0_36 = arith.constant 0 : index
    %c0_37 = arith.constant 0 : index
    %42 = vector.load %arg7[%c1_35, %c0_36, %c0_37] : memref<4x8x32xbf16, #tpu.memory_space<vmem>>, vector<1x8x32xbf16>
    %43 = vector.shape_cast %42 : vector<1x8x32xbf16> to vector<8x32xbf16>
    %cst_38 = arith.constant dense<0.000000e+00> : vector<8x8xf32>
    %44 = tpu.matmul %1, %37, %cst_38 {dimension_numbers = #tpu.dot_dimension_numbers<[1], [0], [0], [1], [0, 0, 1, 1], [], []>} : vector<8x32xbf16>, vector<32x8xbf16>, vector<8x8xf32> -> vector<8x8xf32>
    %45 = arith.truncf %44 : vector<8x8xf32> to vector<8x8xbf16>
    %cst_39 = arith.constant dense<0.000000e+00> : vector<8x8xf32>
    %46 = tpu.matmul %3, %39, %cst_39 {dimension_numbers = #tpu.dot_dimension_numbers<[1], [0], [0], [1], [0, 0, 1, 1], [], []>} : vector<8x32xbf16>, vector<32x8xbf16>, vector<8x8xf32> -> vector<8x8xf32>
    %47 = arith.truncf %46 : vector<8x8xf32> to vector<8x8xbf16>
    %cst_40 = arith.constant dense<0.000000e+00> : vector<8x8xf32>
    %48 = tpu.matmul %3, %41, %cst_40 {dimension_numbers = #tpu.dot_dimension_numbers<[1], [0], [0], [1], [0, 0, 1, 1], [], []>} : vector<8x32xbf16>, vector<32x8xbf16>, vector<8x8xf32> -> vector<8x8xf32>
    %49 = arith.truncf %48 : vector<8x8xf32> to vector<8x8xbf16>
    %cst_41 = arith.constant dense<0.000000e+00> : vector<8x8xf32>
    %50 = tpu.matmul %45, %47, %cst_41 {dimension_numbers = #tpu.dot_dimension_numbers<[1], [1], [0], [0], [0, 0, 1, 0], [], []>} : vector<8x8xbf16>, vector<8x8xbf16>, vector<8x8xf32> -> vector<8x8xf32>
    %cst_42 = arith.constant dense<0xFF800000> : vector<8xf32>
    %51 = vector.multi_reduction <maximumf>, %50, %cst_42 [1] : vector<8x8xf32> to vector<8xf32>
    %52 = vector.shape_cast %51 : vector<8xf32> to vector<8x1xf32>
    %53 = vector.broadcast %52 : vector<8x1xf32> to vector<8x8xf32>
    %54 = arith.subf %50, %53 : vector<8x8xf32>
    %55 = math.exp %54 : vector<8x8xf32>
    %cst_43 = arith.constant dense<0.000000e+00> : vector<8xf32>
    %56 = vector.multi_reduction <add>, %55, %cst_43 [1] : vector<8x8xf32> to vector<8xf32>
    %57 = vector.shape_cast %56 : vector<8xf32> to vector<8x1xf32>
    %58 = tpu.reciprocal %57 {approx = true} : vector<8x1xf32> -> vector<8x1xf32>
    %59 = arith.truncf %55 : vector<8x8xf32> to vector<8x8xbf16>
    %cst_44 = arith.constant dense<0.000000e+00> : vector<8x8xf32>
    %60 = tpu.matmul %59, %49, %cst_44 {dimension_numbers = #tpu.dot_dimension_numbers<[1], [0], [0], [1], [0, 0, 1, 1], [], []>} : vector<8x8xbf16>, vector<8x8xbf16>, vector<8x8xf32> -> vector<8x8xf32>
    %61 = vector.broadcast %58 : vector<8x1xf32> to vector<8x8xf32>
    %62 = arith.mulf %60, %61 : vector<8x8xf32>
    %63 = arith.truncf %62 : vector<8x8xf32> to vector<8x8xbf16>
    %cst_45 = arith.constant dense<0.000000e+00> : vector<8x32xf32>
    %64 = tpu.matmul %63, %43, %cst_45 {dimension_numbers = #tpu.dot_dimension_numbers<[1], [0], [0], [1], [0, 0, 1, 1], [], []>} : vector<8x8xbf16>, vector<8x32xbf16>, vector<8x32xf32> -> vector<8x32xf32>
    %65 = arith.addf %35, %64 : vector<8x32xf32>
    %c2 = arith.constant 2 : index
    %c0_46 = arith.constant 0 : index
    %c0_47 = arith.constant 0 : index
    %66 = vector.load %arg4[%c2, %c0_46, %c0_47] : memref<4x32x8xbf16, #tpu.memory_space<vmem>>, vector<1x32x8xbf16>
    %67 = vector.shape_cast %66 : vector<1x32x8xbf16> to vector<32x8xbf16>
    %c2_48 = arith.constant 2 : index
    %c0_49 = arith.constant 0 : index
    %c0_50 = arith.constant 0 : index
    %68 = vector.load %arg5[%c2_48, %c0_49, %c0_50] : memref<4x32x8xbf16, #tpu.memory_space<vmem>>, vector<1x32x8xbf16>
    %69 = vector.shape_cast %68 : vector<1x32x8xbf16> to vector<32x8xbf16>
    %c2_51 = arith.constant 2 : index
    %c0_52 = arith.constant 0 : index
    %c0_53 = arith.constant 0 : index
    %70 = vector.load %arg6[%c2_51, %c0_52, %c0_53] : memref<4x32x8xbf16, #tpu.memory_space<vmem>>, vector<1x32x8xbf16>
    %71 = vector.shape_cast %70 : vector<1x32x8xbf16> to vector<32x8xbf16>
    %c2_54 = arith.constant 2 : index
    %c0_55 = arith.constant 0 : index
    %c0_56 = arith.constant 0 : index
    %72 = vector.load %arg7[%c2_54, %c0_55, %c0_56] : memref<4x8x32xbf16, #tpu.memory_space<vmem>>, vector<1x8x32xbf16>
    %73 = vector.shape_cast %72 : vector<1x8x32xbf16> to vector<8x32xbf16>
    %cst_57 = arith.constant dense<0.000000e+00> : vector<8x8xf32>
    %74 = tpu.matmul %1, %67, %cst_57 {dimension_numbers = #tpu.dot_dimension_numbers<[1], [0], [0], [1], [0, 0, 1, 1], [], []>} : vector<8x32xbf16>, vector<32x8xbf16>, vector<8x8xf32> -> vector<8x8xf32>
    %75 = arith.truncf %74 : vector<8x8xf32> to vector<8x8xbf16>
    %cst_58 = arith.constant dense<0.000000e+00> : vector<8x8xf32>
    %76 = tpu.matmul %3, %69, %cst_58 {dimension_numbers = #tpu.dot_dimension_numbers<[1], [0], [0], [1], [0, 0, 1, 1], [], []>} : vector<8x32xbf16>, vector<32x8xbf16>, vector<8x8xf32> -> vector<8x8xf32>
    %77 = arith.truncf %76 : vector<8x8xf32> to vector<8x8xbf16>
    %cst_59 = arith.constant dense<0.000000e+00> : vector<8x8xf32>
    %78 = tpu.matmul %3, %71, %cst_59 {dimension_numbers = #tpu.dot_dimension_numbers<[1], [0], [0], [1], [0, 0, 1, 1], [], []>} : vector<8x32xbf16>, vector<32x8xbf16>, vector<8x8xf32> -> vector<8x8xf32>
    %79 = arith.truncf %78 : vector<8x8xf32> to vector<8x8xbf16>
    %cst_60 = arith.constant dense<0.000000e+00> : vector<8x8xf32>
    %80 = tpu.matmul %75, %77, %cst_60 {dimension_numbers = #tpu.dot_dimension_numbers<[1], [1], [0], [0], [0, 0, 1, 0], [], []>} : vector<8x8xbf16>, vector<8x8xbf16>, vector<8x8xf32> -> vector<8x8xf32>
    %cst_61 = arith.constant dense<0xFF800000> : vector<8xf32>
    %81 = vector.multi_reduction <maximumf>, %80, %cst_61 [1] : vector<8x8xf32> to vector<8xf32>
    %82 = vector.shape_cast %81 : vector<8xf32> to vector<8x1xf32>
    %83 = vector.broadcast %82 : vector<8x1xf32> to vector<8x8xf32>
    %84 = arith.subf %80, %83 : vector<8x8xf32>
    %85 = math.exp %84 : vector<8x8xf32>
    %cst_62 = arith.constant dense<0.000000e+00> : vector<8xf32>
    %86 = vector.multi_reduction <add>, %85, %cst_62 [1] : vector<8x8xf32> to vector<8xf32>
    %87 = vector.shape_cast %86 : vector<8xf32> to vector<8x1xf32>
    %88 = tpu.reciprocal %87 {approx = true} : vector<8x1xf32> -> vector<8x1xf32>
    %89 = arith.truncf %85 : vector<8x8xf32> to vector<8x8xbf16>
    %cst_63 = arith.constant dense<0.000000e+00> : vector<8x8xf32>
    %90 = tpu.matmul %89, %79, %cst_63 {dimension_numbers = #tpu.dot_dimension_numbers<[1], [0], [0], [1], [0, 0, 1, 1], [], []>} : vector<8x8xbf16>, vector<8x8xbf16>, vector<8x8xf32> -> vector<8x8xf32>
    %91 = vector.broadcast %88 : vector<8x1xf32> to vector<8x8xf32>
    %92 = arith.mulf %90, %91 : vector<8x8xf32>
    %93 = arith.truncf %92 : vector<8x8xf32> to vector<8x8xbf16>
    %cst_64 = arith.constant dense<0.000000e+00> : vector<8x32xf32>
    %94 = tpu.matmul %93, %73, %cst_64 {dimension_numbers = #tpu.dot_dimension_numbers<[1], [0], [0], [1], [0, 0, 1, 1], [], []>} : vector<8x8xbf16>, vector<8x32xbf16>, vector<8x32xf32> -> vector<8x32xf32>
    %95 = arith.addf %65, %94 : vector<8x32xf32>
    %c3 = arith.constant 3 : index
    %c0_65 = arith.constant 0 : index
    %c0_66 = arith.constant 0 : index
    %96 = vector.load %arg4[%c3, %c0_65, %c0_66] : memref<4x32x8xbf16, #tpu.memory_space<vmem>>, vector<1x32x8xbf16>
    %97 = vector.shape_cast %96 : vector<1x32x8xbf16> to vector<32x8xbf16>
    %c3_67 = arith.constant 3 : index
    %c0_68 = arith.constant 0 : index
    %c0_69 = arith.constant 0 : index
    %98 = vector.load %arg5[%c3_67, %c0_68, %c0_69] : memref<4x32x8xbf16, #tpu.memory_space<vmem>>, vector<1x32x8xbf16>
    %99 = vector.shape_cast %98 : vector<1x32x8xbf16> to vector<32x8xbf16>
    %c3_70 = arith.constant 3 : index
    %c0_71 = arith.constant 0 : index
    %c0_72 = arith.constant 0 : index
    %100 = vector.load %arg6[%c3_70, %c0_71, %c0_72] : memref<4x32x8xbf16, #tpu.memory_space<vmem>>, vector<1x32x8xbf16>
    %101 = vector.shape_cast %100 : vector<1x32x8xbf16> to vector<32x8xbf16>
    %c3_73 = arith.constant 3 : index
    %c0_74 = arith.constant 0 : index
    %c0_75 = arith.constant 0 : index
    %102 = vector.load %arg7[%c3_73, %c0_74, %c0_75] : memref<4x8x32xbf16, #tpu.memory_space<vmem>>, vector<1x8x32xbf16>
    %103 = vector.shape_cast %102 : vector<1x8x32xbf16> to vector<8x32xbf16>
    %cst_76 = arith.constant dense<0.000000e+00> : vector<8x8xf32>
    %104 = tpu.matmul %1, %97, %cst_76 {dimension_numbers = #tpu.dot_dimension_numbers<[1], [0], [0], [1], [0, 0, 1, 1], [], []>} : vector<8x32xbf16>, vector<32x8xbf16>, vector<8x8xf32> -> vector<8x8xf32>
    %105 = arith.truncf %104 : vector<8x8xf32> to vector<8x8xbf16>
    %cst_77 = arith.constant dense<0.000000e+00> : vector<8x8xf32>
    %106 = tpu.matmul %3, %99, %cst_77 {dimension_numbers = #tpu.dot_dimension_numbers<[1], [0], [0], [1], [0, 0, 1, 1], [], []>} : vector<8x32xbf16>, vector<32x8xbf16>, vector<8x8xf32> -> vector<8x8xf32>
    %107 = arith.truncf %106 : vector<8x8xf32> to vector<8x8xbf16>
    %cst_78 = arith.constant dense<0.000000e+00> : vector<8x8xf32>
    %108 = tpu.matmul %3, %101, %cst_78 {dimension_numbers = #tpu.dot_dimension_numbers<[1], [0], [0], [1], [0, 0, 1, 1], [], []>} : vector<8x32xbf16>, vector<32x8xbf16>, vector<8x8xf32> -> vector<8x8xf32>
    %109 = arith.truncf %108 : vector<8x8xf32> to vector<8x8xbf16>
    %cst_79 = arith.constant dense<0.000000e+00> : vector<8x8xf32>
    %110 = tpu.matmul %105, %107, %cst_79 {dimension_numbers = #tpu.dot_dimension_numbers<[1], [1], [0], [0], [0, 0, 1, 0], [], []>} : vector<8x8xbf16>, vector<8x8xbf16>, vector<8x8xf32> -> vector<8x8xf32>
    %cst_80 = arith.constant dense<0xFF800000> : vector<8xf32>
    %111 = vector.multi_reduction <maximumf>, %110, %cst_80 [1] : vector<8x8xf32> to vector<8xf32>
    %112 = vector.shape_cast %111 : vector<8xf32> to vector<8x1xf32>
    %113 = vector.broadcast %112 : vector<8x1xf32> to vector<8x8xf32>
    %114 = arith.subf %110, %113 : vector<8x8xf32>
    %115 = math.exp %114 : vector<8x8xf32>
    %cst_81 = arith.constant dense<0.000000e+00> : vector<8xf32>
    %116 = vector.multi_reduction <add>, %115, %cst_81 [1] : vector<8x8xf32> to vector<8xf32>
    %117 = vector.shape_cast %116 : vector<8xf32> to vector<8x1xf32>
    %118 = tpu.reciprocal %117 {approx = true} : vector<8x1xf32> -> vector<8x1xf32>
    %119 = arith.truncf %115 : vector<8x8xf32> to vector<8x8xbf16>
    %cst_82 = arith.constant dense<0.000000e+00> : vector<8x8xf32>
    %120 = tpu.matmul %119, %109, %cst_82 {dimension_numbers = #tpu.dot_dimension_numbers<[1], [0], [0], [1], [0, 0, 1, 1], [], []>} : vector<8x8xbf16>, vector<8x8xbf16>, vector<8x8xf32> -> vector<8x8xf32>
    %121 = vector.broadcast %118 : vector<8x1xf32> to vector<8x8xf32>
    %122 = arith.mulf %120, %121 : vector<8x8xf32>
    %123 = arith.truncf %122 : vector<8x8xf32> to vector<8x8xbf16>
    %cst_83 = arith.constant dense<0.000000e+00> : vector<8x32xf32>
    %124 = tpu.matmul %123, %103, %cst_83 {dimension_numbers = #tpu.dot_dimension_numbers<[1], [0], [0], [1], [0, 0, 1, 1], [], []>} : vector<8x8xbf16>, vector<8x32xbf16>, vector<8x32xf32> -> vector<8x32xf32>
    %125 = arith.addf %95, %124 : vector<8x32xf32>
    %126 = vector.broadcast %4 : vector<1x32xf32> to vector<8x32xf32>
    %127 = arith.addf %125, %126 : vector<8x32xf32>
    %c0_84 = arith.constant 0 : index
    %c0_85 = arith.constant 0 : index
    %c0_86 = arith.constant 0 : index
    %128 = vector.load %arg9[%c0_84, %c0_85, %c0_86] : memref<1x8x32xf32, #tpu.memory_space<vmem>>, vector<1x8x32xf32>
    %129 = vector.shape_cast %128 : vector<1x8x32xf32> to vector<8x32xf32>
    %130 = vector.shape_cast %127 : vector<8x32xf32> to vector<1x8x32xf32>
    tpu.vector_store %arg9[%c0_84, %c0_85, %c0_86], %130 {strides = array<i32>} : memref<1x8x32xf32, #tpu.memory_space<vmem>>, vector<1x8x32xf32>,
    return
  }
  func.func @transform_0(%arg0: i32, %arg1: i32) -> (i32, i32, i32) {
    %c0_i32 = arith.constant 0 : i32
    %c0_i32_0 = arith.constant 0 : i32
    return %arg0, %arg1, %c0_i32 : i32, i32, i32
  }
  func.func @transform_1(%arg0: i32, %arg1: i32) -> (i32, i32, i32) {
    %c0_i32 = arith.constant 0 : i32
    %c0_i32_0 = arith.constant 0 : i32
    %c0_i32_1 = arith.constant 0 : i32
    return %arg0, %c0_i32, %c0_i32_0 : i32, i32, i32
  }
  func.func @transform_2(%arg0: i32, %arg1: i32) -> (i32, i32, i32) {
    %c0_i32 = arith.constant 0 : i32
    %c0_i32_0 = arith.constant 0 : i32
    %c0_i32_1 = arith.constant 0 : i32
    %c0_i32_2 = arith.constant 0 : i32
    return %c0_i32, %c0_i32_0, %c0_i32_1 : i32, i32, i32
  }
  func.func @transform_3(%arg0: i32, %arg1: i32) -> (i32, i32, i32) {
    %c0_i32 = arith.constant 0 : i32
    %c0_i32_0 = arith.constant 0 : i32
    %c0_i32_1 = arith.constant 0 : i32
    %c0_i32_2 = arith.constant 0 : i32
    return %c0_i32, %c0_i32_0, %c0_i32_1 : i32, i32, i32
  }
  func.func @transform_4(%arg0: i32, %arg1: i32) -> (i32, i32, i32) {
    %c0_i32 = arith.constant 0 : i32
    %c0_i32_0 = arith.constant 0 : i32
    %c0_i32_1 = arith.constant 0 : i32
    %c0_i32_2 = arith.constant 0 : i32
    return %c0_i32, %c0_i32_0, %c0_i32_1 : i32, i32, i32
  }
  func.func @transform_5(%arg0: i32, %arg1: i32) -> (i32, i32, i32) {
    %c0_i32 = arith.constant 0 : i32
    %c0_i32_0 = arith.constant 0 : i32
    %c0_i32_1 = arith.constant 0 : i32
    %c0_i32_2 = arith.constant 0 : i32
    return %c0_i32, %c0_i32_0, %c0_i32_1 : i32, i32, i32
  }
  func.func @transform_6(%arg0: i32, %arg1: i32) -> (i32, i32) {
    %c0_i32 = arith.constant 0 : i32
    %c0_i32_0 = arith.constant 0 : i32
    %c0_i32_1 = arith.constant 0 : i32
    return %c0_i32, %c0_i32_0 : i32, i32
  }
  func.func @transform_7(%arg0: i32, %arg1: i32) -> (i32, i32, i32) {
    %c0_i32 = arith.constant 0 : i32
    %c0_i32_0 = arith.constant 0 : i32
    return %arg0, %arg1, %c0_i32 : i32, i32, i32
  }
}

</mosaic_0001>

<bundles_post_ra>
// kernel: tpu_custom_call.1
= control target key start
LH: loop header
LB: loop body
LE: loop exit
PB: predicated region body
PF: predicated region fallthrough
CT: control target
= control target key end

     0   :  { %12 = vsyncpa [#allocation3], 0  ;;  %s2639_s0 = inlined_call_operand.vmem [shape: bf16[2,8,32], index: 0, kind: input, shape index: {}]   ;;  %s2640_s1 = inlined_call_operand.vmem [shape: bf16[2,8,32], index: 1, kind: input, shape index: {}]   ;;  %s2641_s2 = inlined_call_operand.vmem [shape: bf16[4,32,8], index: 2, kind: input, shape index: {}]   ;;  %s2642_s3 = inlined_call_operand.vmem [shape: bf16[4,32,8], index: 3, kind: input, shape index: {}]   ;;  %s2643_s4 = inlined_call_operand.vmem [shape: bf16[4,32,8], index: 4, kind: input, shape index: {}]   ;;  %s2644_s5 = inlined_call_operand.vmem [shape: bf16[4,8,32], index: 5, kind: input, shape index: {}]   ;;  %s2645_s6 = inlined_call_operand.vmem [shape: f32[1,32], index: 6, kind: input, shape index: {}]   ;;  %s2646_s7 = inlined_call_operand.hbm [shape: f32[2,8,32], index: 7, kind: output, shape index: {}]  }
   0x1   :  { %14 = vsyncpa [#allocation3 + $0x1], 0  ;;  %s2287_s24 = smov 0   ;;  %s2289_s25 = smov 0  }
   0x2   :  { %s2291_s26 = smov 0   ;;  %s2293_s27 = smov 0  }
   0x3   :  { %s2295_s28 = smov 0   ;;  %s2297_s29 = smov 0  }
   0x4 LB: > { %s1741_s30 = sadd.s32 4294967295, %s2242_s29   ;;  %s1742_s8 = sadd.s32 4294967294, %s2242_s29   ;;  %s2242_s29 = sphi %s2297_s29, %s20_s29   ;;  %s2238_s28 = sphi %s2295_s28, %s2653_s28   ;;  %s2234_s27 = sphi %s2293_s27, %s2652_s27   ;;  %s2230_s26 = sphi %s2291_s26, %s2651_s26   ;;  %s2226_s25 = sphi %s2289_s25, %s2650_s25   ;;  %s2222_s24 = sphi %s2287_s24, %s2649_s24  }
   0x5   : > { %s32_s9 = sadd.s32 1, %s2238_s28  ;;  %s200_s10 = sadd.s32 1, %s2230_s26 }
   0x6   : > { %p34_p0 = scmp.ge.s32.totalorder %s32_s9, 2  ;;  %p210_p1 = scmp.ne.s32.totalorder %s2230_s26, %s2226_s25 }
   0x7   : > { %p211_p2 = scmp.eq.s32.totalorder %s1741_s30, 1  ;;  %p216_p3 = scmp.ne.s32.totalorder %s2226_s25, %s2222_s24 }
   0x8   : > { %s2655_s9 = smov (%p34_p0, %s32_s9), 0  ;;  %p217_p5 = scmp.eq.s32.totalorder %s1742_s8, 1 }
   0x9   : > { %p2327_p4 = por %p211_p2, %p210_p1  ;;  %s195_s12 = ssub.s32 %s2238_s28, %s2655_s9 }
   0xa   : > { %p1745_p6 = scmp.ge.s32.totalorder %s2242_s29, 1  ;;  %p198_p7 = scmp.eq.s32.totalorder %s195_s12, 0 }
   0xb   : > { %p2334_p8 = por %p217_p5, %p216_p3  ;;  %p267_p9 = scmp.lt.s32.totalorder %s2242_s29, 3 }
   0xc   : > { %s2340_s14 = scalar_select %p198_p7, %s2230_s26, %s200_s10  }
   0xd   : > { %p268_p10 = pnand %p1745_p6, %p267_p9 }
   0xe   : > { %p305_p11 = scmp.lt.s32.totalorder (!%p268_p10), %s2234_s27, 1  ;;  %s1838_s18 = sshll.u32 (!%p268_p10), %s2234_s27, 7 }
   0xf   : > { %271 = sbr.rel (%p268_p10) target bundleno = 3067 (0xbfb), region = 48  ;;  %s2246_s8 = smov (!%p268_p10), [#allocation2]  }
  0x10   : > { %s2170_s10 = sshll.u32 (!%p268_p10), %s2246_s8, 4  ;;  %s2171_s10 = int_to_ptr.vmem [resolvable:$false] %s2170_s10 }
  0x14   : > { %v2126_v0 = vld [vmem:[%s2642_s3 + $0x8] sm:$0xff]   ;;  %v2244_v1 = vmov 0.0   ;;  %v2128_v3 = vld [vmem:[%s2642_s3] sm:$0xff]   ;;  %vm2245_vm0 = vmmov 0   ;;  %s306_s23 = scalar_select %p305_p11, %s2234_s27, 1  ;;  %vm345_vm1 = vcmask 261120  }
  0x15   : > { %1909 = vmatprep.subr.bf16.mxu1 %v2244_v1  ;;  %1901 = vmatprep.subr.bf16.mxu0 %v2244_v1  ;;  %v2127_v2 = vld [vmem:[%s2641_s2 + $0x8] sm:$0xff]   ;;  %v2129_v4 = vld [vmem:[%s2641_s2] sm:$0xff]   ;;  %vm499_vm2 = vcmask 64512   ;;  %vm560_vm3 = vcmask 1043456   ;;  %v2133_v31 = vld [vmem:[%s2641_s2 + $0x18] sm:$0xff]  }
  0x16   : > { %1910 = vmatpush3.bf16.msra.mxu1 %v2126_v0  ;;  %1913 = vmatprep.mubr.msk.bf16.mxu1 %vm2245_vm0, %v2244_v1  ;;  %s1747_s30 = sshll.u32 %s306_s23, 2  ;;  %v2130_v7 = vld [vmem:[%s2643_s4 + $0x8] sm:$0xff]   ;;  %v2131_v8 = vld [vmem:[%s2643_s4] sm:$0xff]   ;;  %v2135_v32 = vld [vmem:[%s2641_s2 + $0x10] sm:$0xff]   ;;  %s2592_s23 = scalar_lea.hbm %s2646_s7, %s1838_s18 }
  0x17   : > { %1902 = vmatpush3.bf16.msra.mxu0 %v2127_v2  ;;  %1911 = vmatprep.subr.bf16.mxu1 %v2244_v1  ;;  %s315_s12 = scalar_lea.vmem %s2640_s1, %s1747_s30  ;;  %s311_s17 = scalar_lea.vmem %s2639_s0, %s1747_s30  ;;  %v2132_v37 = vld [vmem:[%s2642_s3 + $0x18] sm:$0xff]   ;;  %v2134_v40 = vld [vmem:[%s2642_s3 + $0x10] sm:$0xff]  }
  0x18   : > { %1903 = vmatprep.subr.bf16.mxu0 %v2244_v1  ;;  %1905 = vmatprep.mubr.msk.bf16.mxu0 %vm2245_vm0, %v2244_v1  ;;  %v2371_v5 = vld [vmem:[%s315_s12] sm:$0xf]  ;;  %v2136_v45 = vld [vmem:[%s2643_s4 + $0x18] sm:$0xff]   ;;  %v2137_v46 = vld [vmem:[%s2643_s4 + $0x10] sm:$0xff]   ;;  %s302_s12 = sand.u32 1, %s2226_s25  }
  0x19   : > { %v2373_v6 = vld [vmem:[%s311_s17] sm:$0xf]  ;;  %s1746_s15 = sshll.u32 %s302_s12, 3  ;;  %s1644_s27 = scalar_lea.sflag [#allocation3], %s302_s12 }
  0x1a   : > { %1912 = vmatpush3.bf16.msra.mxu1 %v2128_v3  ;;  %s304_s19 = scalar_lea.vmem [#allocation2], %s1746_s15  ;;  %s2172_s15 = scalar_lea.vmem %s2171_s10, 256 }
  0x1b   : > { %1904 = vmatpush3.bf16.msra.mxu0 %v2129_v4  ;;  %1925 = vmatprep.subr.bf16.mxu1 %v2244_v1  ;;  %s1658_s20 = sshll.u32 %s304_s19, 4  ;;  %s2594_s20 = int_to_ptr.vmem [resolvable:$true] %s1658_s20 }
  0x1c   : > { %1917 = vmatprep.subr.bf16.mxu0 %v2244_v1  ;;  %s2166_s30 = scalar_lea.vmem %s2594_s20, 128  ;;  %p2173_p1 = scmp.lt.s32.totalorder %s2594_s20, %s2171_s10 }
  0x1d   : > { %1914 = vmatmul.mubr.msk.bf16.vlgmr.msra.gmra.mxu1 %vm345_vm1, %v2371_v5  ;;  %p2167_p12 = scmp.ne.s32.totalorder %s2594_s20, %s2166_s30  ;;  %p2174_p2 = scmp.lt.s32.totalorder %s2172_s15, %s2166_s30 }
  0x1e   : > { %1906 = vmatmul.mubr.msk.bf16.vlgmr.msra.gmra.mxu0 %vm345_vm1, %v2373_v6  ;;  %1927 = vmatprep.mubr.msk.bf16.mxu1 %vm2245_vm0, %v2244_v1 }
  0x1f   : > { %1921 = vmatprep.mubr.msk.bf16.mxu0 %vm2245_vm0, %v2244_v1  ;;  %1918 = vmatpush3.bf16.msra.mxu0 %v2130_v7  ;;  %p2168_p13 = pnand %p2167_p12, %p2327_p4  ;;  %p2175_p3 = por %p2174_p2, %p2173_p1 }
  0x20   : > { %1919 = vmatprep.subr.bf16.mxu0 %v2244_v1 }
  0x21   : > { %p2169_p0 = pneg %p2168_p13 }
  0x23   : > { %1920 = vmatpush3.bf16.msra.mxu0 %v2131_v8  ;;  %p2176_p5 = pnand %p2175_p3, %p2169_p0 }
  0x24   : > { %1931 = vmatprep.subr.bf16.mxu0 %v2244_v1 }
  0x26   : > { %1922 = vmatmul.mubr.msk.bf16.vlgmr.msra.gmra.mxu0 %vm345_vm1, %v2371_v5 }
  0x27   : > { %1933 = vmatprep.mubr.msk.bf16.mxu0 %vm2245_vm0, %v2244_v1 }
  0xdd   : > { %v439_v9 = vpop.f32.mrf.mxu1 }
  0xde   : > { %v445_v10 = vpack.c.bf16 %v439_v9, %v439_v9  ;;  %v383_v11 = vpop.f32.mrf.mxu0 }
  0xdf   : > { %v1915_v12 = vpop.f32.mrf.mxu1  ;;  %v389_v18 = vpack.c.bf16 %v383_v11, %v383_v11 }
  0xe0   : > { %v504_v13 = vsel %vm499_vm2, %v445_v10, 0  ;;  %v1907_v14 = vpop.f32.mrf.mxu0  ;;  %v332_v12 = vld [vmem:[%s2644_s5] sm:$0xf] }
  0xe1   : > { %v442_v15 = vpop.f32.mrf.mxu1  ;;  %1926 = vmatpush3.bf16.xpose.msra.mxu1 %v504_v13 }
  0xe2   : > { %v386_v16 = vpop.f32.mrf.mxu0  ;;  %1937 = vmatprep.subr.bf16.mxu1 %v2244_v1 }
  0xe3   : > { %v1916_v17 = vpop.f32.mrf.mxu1  ;;  %v937_v16 = vsel %vm560_vm3, %v332_v12, 0 }
  0xe4   : > { %v1908_v19 = vpop.f32.mrf.mxu0 }
  0xe6   : > { %v492_v25 = vpop.f32.mrf.mxu0 }
  0xe7   : > { %v498_v26 = vpack.c.bf16 %v492_v25, %v492_v25 }
  0xe8   : > { %1928 = vmatmul.mubr.msk.bf16.vlgmr.msra.gmra.mxu1 %vm499_vm2, %v389_v18  ;;  %v1923_v27 = vpop.f32.mrf.mxu0 }
  0xe9   : > { %1941 = vmatprep.mubr.msk.bf16.mxu1 %vm2245_vm0, %v2244_v1  ;;  %v562_v28 = vsel %vm560_vm3, %v498_v26, 0  ;;  %1938 = vmatpush3.bf16.msra.mxu1 %v2133_v31 }
  0xea   : > { %v495_v29 = vpop.f32.mrf.mxu0  ;;  %1932 = vmatpush3.bf16.msra.mxu0 %v562_v28  ;;  %1939 = vmatprep.subr.bf16.mxu1 %v2244_v1 }
  0xeb   : > { %1945 = vmatprep.subr.bf16.mxu0 %v2244_v1  ;;  %v2140_v29 = vld [vmem:[%s2641_s2 + $0x28] sm:$0xff]  }
  0xec   : > { %v1924_v30 = vpop.f32.mrf.mxu0 }
  0xed   : > { %1940 = vmatpush3.bf16.msra.mxu1 %v2135_v32 }
  0xee   : > { %1953 = vmatprep.subr.bf16.mxu1 %v2244_v1 }
  0xf0   : > { %1942 = vmatmul.mubr.msk.bf16.vlgmr.msra.gmra.mxu1 %vm345_vm1, %v2373_v6 }
  0xf1   : > { %1957 = vmatprep.mubr.msk.bf16.mxu1 %vm2245_vm0, %v2244_v1  ;;  %1954 = vmatpush3.bf16.msra.mxu1 %v2136_v45  ;;  %v2143_v45 = vld [vmem:[%s2643_s4 + $0x20] sm:$0xff]  }
  0xf2   : > { %1955 = vmatprep.subr.bf16.mxu1 %v2244_v1 }
  0xf5   : > { %1956 = vmatpush3.bf16.msra.mxu1 %v2137_v46 }
  0xf6   : > { %1967 = vmatprep.subr.bf16.mxu1 %v2244_v1 }
  0xf8   : > { %1958 = vmatmul.mubr.msk.bf16.vlgmr.msra.gmra.mxu1 %vm345_vm1, %v2371_v5 }
  0xf9   : > { %1969 = vmatprep.mubr.msk.bf16.mxu1 %vm2245_vm0, %v2244_v1 }
 0x1a8   : > { %v540_v20 = vpop.f32.mrf.mxu1 }
 0x1a9   : > { %v546_v21 = vsel %vm499_vm2, %v540_v20, -inf }
 0x1aa   : > { %547 = vmax.xlane.f32.xlu0 %v546_v21  ;;  %v1929_v22 = vpop.f32.mrf.mxu1  ;;  %v1772_v21 = vld [vmem:[%s2644_s5 + $0x4] sm:$0xf] }
 0x1ab   : > { %v891_v22 = vsel %vm560_vm3, %v1772_v21, 0 }
 0x1ac   : > { %v543_v23 = vpop.f32.mrf.mxu1 }
 0x1ad   : > { %v2139_v23 = vld [vmem:[%s2642_s3 + $0x20] sm:$0xff]  }
 0x1ae   : > { %v1930_v24 = vpop.f32.mrf.mxu1 }
 0x1b0   : > { %v669_v41 = vpop.f32.mrf.mxu1 }
 0x1b1   : > { %v675_v57 = vpack.c.bf16 %v669_v41, %v669_v41 }
 0x1b2   : > { %v1943_v42 = vpop.f32.mrf.mxu1 }
 0x1b4   : > { %v672_v43 = vpop.f32.mrf.mxu1 }
 0x1b6   : > { %v1944_v44 = vpop.f32.mrf.mxu1 }
 0x1b7   : > { %v2142_v44 = vld [vmem:[%s2643_s4 + $0x28] sm:$0xff]  }
 0x1b8   : > { %v775_v63 = vpop.f32.mrf.mxu1 }
 0x1b9   : > { %v781_v0 = vpack.c.bf16 %v775_v63, %v775_v63 }
 0x1ba   : > { %v1959_v2 = vpop.f32.mrf.mxu1 }
 0x1bb   : > { %v843_v3 = vsel %vm560_vm3, %v781_v0, 0 }
 0x1bc   : > { %v778_v4 = vpop.f32.mrf.mxu1  ;;  %1968 = vmatpush3.bf16.msra.mxu1 %v843_v3 }
 0x1bd   : > { %1979 = vmatprep.subr.bf16.mxu1 %v2244_v1 }
 0x1be   : > { %v1960_v7 = vpop.f32.mrf.mxu1 }
 0x233   : > { %v548_v33 = vpop.xlane.xlu0 %547 }
 0x234   : > { %v549_v34 = vsub.f32 %v540_v20, %v548_v33  ;;  %v2138_v20 = vld [vmem:[%s2642_s3 + $0x28] sm:$0xff]   ;;  %v2141_v33 = vld [vmem:[%s2641_s2 + $0x20] sm:$0xff]  }
 0x236   : > { %v550_v35 = vmul.f32 1.442695, %v549_v34 }
 0x238   : > { %2150 = vpow2.f32 %v550_v35 }
 0x245   : > { %v2151_v36 = vpop.eup %2150 }
 0x246   : > { %v552_v38 = vsel %vm499_vm2, %v2151_v36, 0.0  ;;  %v556_v39 = vpack.c.bf16 %v2151_v36, %v2151_v36 }
 0x247   : > { %553 = vadd.xlane.f32.xlu1 %v552_v38 }
 0x248   : > { %1934 = vmatmul.mubr.msk.bf16.vlgmr.msra.gmra.mxu0 %vm499_vm2, %v556_v39 }
 0x249   : > { %1946 = vmatpush3.bf16.msra.mxu0 %v2132_v37  ;;  %1949 = vmatprep.mubr.msk.bf16.mxu0 %vm2245_vm0, %v2244_v1 }
 0x24a   : > { %1947 = vmatprep.subr.bf16.mxu0 %v2244_v1 }
 0x24d   : > { %1948 = vmatpush3.bf16.msra.mxu0 %v2134_v40 }
 0x24e   : > { %1961 = vmatprep.subr.bf16.mxu0 %v2244_v1 }
 0x250   : > { %1950 = vmatmul.mubr.msk.bf16.vlgmr.msra.gmra.mxu0 %vm345_vm1, %v2371_v5 }
 0x251   : > { %1963 = vmatprep.mubr.msk.bf16.mxu0 %vm2245_vm0, %v2244_v1 }
 0x2d0   : > { %v554_v11 = vpop.xlane.xlu1 %553 }
 0x308   : > { %v598_v47 = vpop.f32.mrf.mxu0 }
 0x30a   : > { %v1935_v48 = vpop.f32.mrf.mxu0 }
 0x30c   : > { %v601_v49 = vpop.f32.mrf.mxu0 }
 0x30e   : > { %v1936_v50 = vpop.f32.mrf.mxu0 }
 0x310   : > { %v722_v51 = vpop.f32.mrf.mxu0 }
 0x311   : > { %v728_v52 = vpack.c.bf16 %v722_v51, %v722_v51 }
 0x312   : > { %v1951_v53 = vpop.f32.mrf.mxu0 }
 0x313   : > { %v786_v54 = vsel %vm499_vm2, %v728_v52, 0 }
 0x314   : > { %v725_v55 = vpop.f32.mrf.mxu0  ;;  %1962 = vmatpush3.bf16.xpose.msra.mxu0 %v786_v54 }
 0x315   : > { %1973 = vmatprep.subr.bf16.mxu0 %v2244_v1 }
 0x316   : > { %v1952_v56 = vpop.f32.mrf.mxu0 }
 0x31b   : > { %1964 = vmatmul.mubr.msk.bf16.vlgmr.msra.gmra.mxu0 %vm499_vm2, %v675_v57 }
 0x31c   : > { %1975 = vmatprep.mubr.msk.bf16.mxu0 %vm2245_vm0, %v2244_v1  ;;  %1974 = vmatpush3.bf16.msra.mxu0 %v891_v22 }
 0x31d   : > { %1985 = vmatprep.subr.bf16.mxu0 %v2244_v1 }
 0x3db   : > { %v822_v58 = vpop.f32.mrf.mxu0 }
 0x3dc   : > { %v828_v59 = vsel %vm499_vm2, %v822_v58, -inf }
 0x3dd   : > { %829 = vmax.xlane.f32.xlu0 %v828_v59  ;;  %v1965_v60 = vpop.f32.mrf.mxu0 }
 0x3df   : > { %v825_v61 = vpop.f32.mrf.mxu0 }
 0x3e1   : > { %v1966_v62 = vpop.f32.mrf.mxu0 }
 0x466   : > { %v830_v8 = vpop.xlane.xlu0 %829 }
 0x467   : > { %v831_v9 = vsub.f32 %v822_v58, %v830_v8 }
 0x469   : > { %v832_v10 = vmul.f32 1.442695, %v831_v9 }
 0x46b   : > { %2152 = vpow2.f32 %v832_v10 }
 0x46c   : > { %2154 = vrcp.f32 %v554_v11  ;;  %v1798_v11 = vld [vmem:[%s2644_s5 + $0x8] sm:$0xf] }
 0x46d   : > { %v1264_v12 = vsel %vm560_vm3, %v1798_v11, 0 }
 0x478   : > { %v2153_v13 = vpop.eup %2152 }
 0x479   : > { %v834_v14 = vsel %vm499_vm2, %v2153_v13, 0.0  ;;  %v838_v15 = vpack.c.bf16 %v2153_v13, %v2153_v13  ;;  %v2155_v17 = vpop.eup %2154  ;;  %v2145_v13 = vld [vmem:[%s2641_s2 + $0x38] sm:$0xff]  }
 0x47a   : > { %835 = vadd.xlane.f32.xlu1 %v834_v14  ;;  %v604_v18 = vmul.f32 %v2155_v17, %v598_v47  ;;  %v2147_v14 = vld [vmem:[%s2641_s2 + $0x30] sm:$0xff]  }
 0x47b   : > { %1970 = vmatmul.mubr.msk.bf16.vlgmr.msra.gmra.mxu1 %vm499_vm2, %v838_v15 }
 0x47c   : > { %1980 = vmatpush3.bf16.msra.mxu1 %v937_v16  ;;  %1981 = vmatprep.mubr.msk.bf16.mxu1 %vm2245_vm0, %v2244_v1  ;;  %v605_v19 = vpack.c.bf16 %v604_v18, %v604_v18 }
 0x47d   : > { %1993 = vmatprep.subr.bf16.mxu1 %v2244_v1 }
 0x483   : > { %1982 = vmatmul.mubr.msk.bf16.vlgmr.msra.gmra.mxu1 %vm499_vm2, %v605_v19 }
 0x484   : > { %1997 = vmatprep.mubr.msk.bf16.mxu1 %vm2245_vm0, %v2244_v1  ;;  %1994 = vmatpush3.bf16.msra.mxu1 %v2138_v20  ;;  %v2144_v20 = vld [vmem:[%s2642_s3 + $0x38] sm:$0xff]  }
 0x485   : > { %1995 = vmatprep.subr.bf16.mxu1 %v2244_v1 }
 0x488   : > { %1996 = vmatpush3.bf16.msra.mxu1 %v2139_v23 }
 0x489   : > { %2009 = vmatprep.subr.bf16.mxu1 %v2244_v1 }
 0x48b   : > { %1998 = vmatmul.mubr.msk.bf16.vlgmr.msra.gmra.mxu1 %vm345_vm1, %v2371_v5 }
 0x48c   : > { %2011 = vmatprep.mubr.msk.bf16.mxu1 %vm2245_vm0, %v2244_v1 }
 0x503   : > { %v836_v24 = vpop.xlane.xlu1 %835 }
 0x504   : > { %2156 = vrcp.f32 %v836_v24 }
 0x511   : > { %v2157_v25 = vpop.eup %2156 }
 0x53b   : > { %v879_v26 = vpop.f32.mrf.mxu1 }
 0x53c   : > { %v885_v27 = vmul.f32 %v2157_v25, %v879_v26 }
 0x53d   : > { %v1971_v28 = vpop.f32.mrf.mxu1 }
 0x53e   : > { %v886_v30 = vpack.c.bf16 %v885_v27, %v885_v27  ;;  %v2148_v28 = vld [vmem:[%s2643_s4 + $0x38] sm:$0xff]  }
 0x53f   : > { %v882_v31 = vpop.f32.mrf.mxu1 }
 0x540   : > { %1976 = vmatmul.mubr.msk.bf16.vlgmr.msra.gmra.mxu0 %vm499_vm2, %v886_v30 }
 0x541   : > { %v1972_v32 = vpop.f32.mrf.mxu1  ;;  %1986 = vmatpush3.bf16.msra.mxu0 %v2140_v29  ;;  %1989 = vmatprep.mubr.msk.bf16.mxu0 %vm2245_vm0, %v2244_v1  ;;  %v2149_v29 = vld [vmem:[%s2643_s4 + $0x30] sm:$0xff]  }
 0x542   : > { %1987 = vmatprep.subr.bf16.mxu0 %v2244_v1 }
 0x543   : > { %v2491_v34 = vpop.f32.mrf.mxu1 }
 0x545   : > { %v1983_v35 = vpop.f32.mrf.mxu1  ;;  %1988 = vmatpush3.bf16.msra.mxu0 %v2141_v33 }
 0x546   : > { %2001 = vmatprep.subr.bf16.mxu0 %v2244_v1 }
 0x547   : > { %v976_v36 = vpop.f32.mrf.mxu1 }
 0x548   : > { %1990 = vmatmul.mubr.msk.bf16.vlgmr.msra.gmra.mxu0 %vm345_vm1, %v2373_v6 }
 0x549   : > { %v1984_v37 = vpop.f32.mrf.mxu1  ;;  %2005 = vmatprep.mubr.msk.bf16.mxu0 %vm2245_vm0, %v2244_v1  ;;  %2002 = vmatpush3.bf16.msra.mxu0 %v2142_v44 }
 0x54a   : > { %2003 = vmatprep.subr.bf16.mxu0 %v2244_v1 }
 0x54b   : > { %v1095_v38 = vpop.f32.mrf.mxu1 }
 0x54c   : > { %v1101_v39 = vpack.c.bf16 %v1095_v38, %v1095_v38 }
 0x54d   : > { %v1999_v40 = vpop.f32.mrf.mxu1  ;;  %2004 = vmatpush3.bf16.msra.mxu0 %v2143_v45 }
 0x54e   : > { %v1159_v41 = vsel %vm499_vm2, %v1101_v39, 0  ;;  %2015 = vmatprep.subr.bf16.mxu0 %v2244_v1 }
 0x54f   : > { %v1098_v42 = vpop.f32.mrf.mxu1  ;;  %2010 = vmatpush3.bf16.xpose.msra.mxu1 %v1159_v41 }
 0x550   : > { %2021 = vmatprep.subr.bf16.mxu1 %v2244_v1  ;;  %2006 = vmatmul.mubr.msk.bf16.vlgmr.msra.gmra.mxu0 %vm345_vm1, %v2371_v5 }
 0x551   : > { %v2000_v43 = vpop.f32.mrf.mxu1  ;;  %2017 = vmatprep.mubr.msk.bf16.mxu0 %vm2245_vm0, %v2244_v1 }
 0x600   : > { %v2512_v46 = vpop.f32.mrf.mxu0 }
 0x601   : > { %v974_v30 = vadd.f32 %v2491_v34, %v2512_v46 }
 0x602   : > { %v1977_v47 = vpop.f32.mrf.mxu0 }
 0x604   : > { %v930_v48 = vpop.f32.mrf.mxu0 }
 0x606   : > { %v1978_v49 = vpop.f32.mrf.mxu0 }
 0x608   : > { %v1042_v50 = vpop.f32.mrf.mxu0 }
 0x609   : > { %v1048_v51 = vpack.c.bf16 %v1042_v50, %v1042_v50 }
 0x60a   : > { %v1991_v52 = vpop.f32.mrf.mxu0 }
 0x60b   : > { %2012 = vmatmul.mubr.msk.bf16.vlgmr.msra.gmra.mxu1 %vm499_vm2, %v1048_v51 }
 0x60c   : > { %v1045_v53 = vpop.f32.mrf.mxu0  ;;  %2023 = vmatprep.mubr.msk.bf16.mxu1 %vm2245_vm0, %v2244_v1  ;;  %2022 = vmatpush3.bf16.msra.mxu1 %v1264_v12 }
 0x60d   : > { %2035 = vmatprep.subr.bf16.mxu1 %v2244_v1 }
 0x60e   : > { %v1992_v54 = vpop.f32.mrf.mxu0 }
 0x610   : > { %v1148_v60 = vpop.f32.mrf.mxu0 }
 0x611   : > { %v1154_v61 = vpack.c.bf16 %v1148_v60, %v1148_v60 }
 0x612   : > { %v2007_v62 = vpop.f32.mrf.mxu0 }
 0x613   : > { %v1216_v63 = vsel %vm560_vm3, %v1154_v61, 0 }
 0x614   : > { %v1151_v0 = vpop.f32.mrf.mxu0  ;;  %2016 = vmatpush3.bf16.msra.mxu0 %v1216_v63 }
 0x615   : > { %2027 = vmatprep.subr.bf16.mxu0 %v2244_v1 }
 0x616   : > { %v2008_v2 = vpop.f32.mrf.mxu0 }
 0x6cb   : > { %v1195_v55 = vpop.f32.mrf.mxu1 }
 0x6cc   : > { %v1201_v56 = vsel %vm499_vm2, %v1195_v55, -inf }
 0x6cd   : > { %1202 = vmax.xlane.f32.xlu0 %v1201_v56  ;;  %v2013_v57 = vpop.f32.mrf.mxu1 }
 0x6cf   : > { %v1198_v58 = vpop.f32.mrf.mxu1 }
 0x6d0   : > { %v1823_v58 = vld [vmem:[%s2644_s5 + $0xc] sm:$0xf] }
 0x6d1   : > { %v2014_v59 = vpop.f32.mrf.mxu1 }
 0x6d2   : > { %v1592_v59 = vsel %vm560_vm3, %v1823_v58, 0 }
 0x756   : > { %v1203_v3 = vpop.xlane.xlu0 %1202 }
 0x757   : > { %v1204_v4 = vsub.f32 %v1195_v55, %v1203_v3 }
 0x759   : > { %v1205_v7 = vmul.f32 1.442695, %v1204_v4 }
 0x75b   : > { %2158 = vpow2.f32 %v1205_v7  ;;  %v1836_v7 = vld [vmem:[%s2645_s6] ss:$0 sm:$0xff] }
 0x768   : > { %v2159_v8 = vpop.eup %2158 }
 0x769   : > { %v1207_v9 = vsel %vm499_vm2, %v2159_v8, 0.0  ;;  %v1211_v10 = vpack.c.bf16 %v2159_v8, %v2159_v8 }
 0x76a   : > { %1208 = vadd.xlane.f32.xlu1 %v1207_v9 }
 0x76b   : > { %2018 = vmatmul.mubr.msk.bf16.vlgmr.msra.gmra.mxu0 %vm499_vm2, %v1211_v10 }
 0x76c   : > { %2031 = vmatprep.mubr.msk.bf16.mxu0 %vm2245_vm0, %v2244_v1  ;;  %2028 = vmatpush3.bf16.msra.mxu0 %v2145_v13 }
 0x76d   : > { %2029 = vmatprep.subr.bf16.mxu0 %v2244_v1 }
 0x770   : > { %2030 = vmatpush3.bf16.msra.mxu0 %v2147_v14 }
 0x771   : > { %2043 = vmatprep.subr.bf16.mxu0 %v2244_v1 }
 0x773   : > { %2032 = vmatmul.mubr.msk.bf16.vlgmr.msra.gmra.mxu0 %vm345_vm1, %v2373_v6  ;;  %v2146_v6 = vld [vmem:[%s2642_s3 + $0x30] sm:$0xff]  }
 0x774   : > { %2047 = vmatprep.mubr.msk.bf16.mxu0 %vm2245_vm0, %v2244_v1  ;;  %2044 = vmatpush3.bf16.msra.mxu0 %v2148_v28 }
 0x775   : > { %2045 = vmatprep.subr.bf16.mxu0 %v2244_v1 }
 0x778   : > { %2046 = vmatpush3.bf16.msra.mxu0 %v2149_v29 }
 0x779   : > { %2057 = vmatprep.subr.bf16.mxu0 %v2244_v1 }
 0x77b   : > { %2048 = vmatmul.mubr.msk.bf16.vlgmr.msra.gmra.mxu0 %vm345_vm1, %v2371_v5 }
 0x77c   : > { %2059 = vmatprep.mubr.msk.bf16.mxu0 %vm2245_vm0, %v2244_v1 }
 0x7f3   : > { %v1209_v15 = vpop.xlane.xlu1 %1208 }
 0x7f4   : > { %2160 = vrcp.f32 %v1209_v15 }
 0x801   : > { %v2161_v16 = vpop.eup %2160 }
 0x82b   : > { %v1252_v17 = vpop.f32.mrf.mxu0 }
 0x82c   : > { %v1258_v18 = vmul.f32 %v2161_v16, %v1252_v17 }
 0x82d   : > { %v2019_v19 = vpop.f32.mrf.mxu0 }
 0x82e   : > { %v1259_v21 = vpack.c.bf16 %v1258_v18, %v1258_v18 }
 0x82f   : > { %v1255_v22 = vpop.f32.mrf.mxu0 }
 0x830   : > { %2024 = vmatmul.mubr.msk.bf16.vlgmr.msra.gmra.mxu1 %vm499_vm2, %v1259_v21 }
 0x831   : > { %v2020_v23 = vpop.f32.mrf.mxu0  ;;  %2036 = vmatpush3.bf16.msra.mxu1 %v2144_v20  ;;  %2039 = vmatprep.mubr.msk.bf16.mxu1 %vm2245_vm0, %v2244_v1 }
 0x832   : > { %2037 = vmatprep.subr.bf16.mxu1 %v2244_v1 }
 0x833   : > { %v1370_v24 = vpop.f32.mrf.mxu0 }
 0x834   : > { %v1376_v42 = vpack.c.bf16 %v1370_v24, %v1370_v24 }
 0x835   : > { %2038 = vmatpush3.bf16.msra.mxu1 %v2146_v6  ;;  %v2033_v25 = vpop.f32.mrf.mxu0 }
 0x836   : > { %2051 = vmatprep.subr.bf16.mxu1 %v2244_v1 }
 0x837   : > { %v1373_v26 = vpop.f32.mrf.mxu0 }
 0x838   : > { %2040 = vmatmul.mubr.msk.bf16.vlgmr.msra.gmra.mxu1 %vm345_vm1, %v2371_v5 }
 0x839   : > { %2053 = vmatprep.mubr.msk.bf16.mxu1 %vm2245_vm0, %v2244_v1  ;;  %v2034_v27 = vpop.f32.mrf.mxu0 }
 0x83b   : > { %v1476_v47 = vpop.f32.mrf.mxu0 }
 0x83c   : > { %v1482_v48 = vpack.c.bf16 %v1476_v47, %v1476_v47 }
 0x83d   : > { %v2049_v49 = vpop.f32.mrf.mxu0 }
 0x83e   : > { %v1544_v50 = vsel %vm560_vm3, %v1482_v48, 0 }
 0x83f   : > { %v1479_v51 = vpop.f32.mrf.mxu0  ;;  %2058 = vmatpush3.bf16.msra.mxu0 %v1544_v50 }
 0x841   : > { %v2050_v52 = vpop.f32.mrf.mxu0 }
 0x8f0   : > { %v1300_v31 = vpop.f32.mrf.mxu1 }
 0x8f1   : > { %v1306_v32 = vadd.f32 %v1300_v31, %v974_v30 }
 0x8f2   : > { %v2025_v33 = vpop.f32.mrf.mxu1 }
 0x8f4   : > { %v1303_v35 = vpop.f32.mrf.mxu1 }
 0x8f6   : > { %v2026_v36 = vpop.f32.mrf.mxu1 }
 0x8f8   : > { %v1423_v37 = vpop.f32.mrf.mxu1 }
 0x8f9   : > { %v1429_v38 = vpack.c.bf16 %v1423_v37, %v1423_v37 }
 0x8fa   : > { %v2041_v39 = vpop.f32.mrf.mxu1 }
 0x8fb   : > { %v1487_v40 = vsel %vm499_vm2, %v1429_v38, 0 }
 0x8fc   : > { %v1426_v41 = vpop.f32.mrf.mxu1  ;;  %2052 = vmatpush3.bf16.xpose.msra.mxu1 %v1487_v40 }
 0x8fd   : > { %2063 = vmatprep.subr.bf16.mxu1 %v2244_v1 }
 0x8fe   : > { %v2042_v5 = vpop.f32.mrf.mxu1 }
 0x903   : > { %2054 = vmatmul.mubr.msk.bf16.vlgmr.msra.gmra.mxu1 %vm499_vm2, %v1376_v42 }
 0x904   : > { %2065 = vmatprep.mubr.msk.bf16.mxu1 %vm2245_vm0, %v2244_v1  ;;  %2064 = vmatpush3.bf16.msra.mxu1 %v1592_v59 }
 0x9c3   : > { %v1523_v34 = vpop.f32.mrf.mxu1 }
 0x9c4   : > { %v1529_v43 = vsel %vm499_vm2, %v1523_v34, -inf }
 0x9c5   : > { %1530 = vmax.xlane.f32.xlu0 %v1529_v43  ;;  %v2055_v44 = vpop.f32.mrf.mxu1 }
 0x9c7   : > { %v1526_v45 = vpop.f32.mrf.mxu1 }
 0x9c9   : > { %v2056_v46 = vpop.f32.mrf.mxu1 }
 0xa4e   : > { %v1531_v53 = vpop.xlane.xlu0 %1530 }
 0xa4f   : > { %v1532_v54 = vsub.f32 %v1523_v34, %v1531_v53 }
 0xa51   : > { %v1533_v55 = vmul.f32 1.442695, %v1532_v54 }
 0xa53   : > { %2162 = vpow2.f32 %v1533_v55 }
 0xa60   : > { %v2163_v1 = vpop.eup %2162 }
 0xa61   : > { %v1535_v56 = vsel %vm499_vm2, %v2163_v1, 0.0  ;;  %v1539_v57 = vpack.c.bf16 %v2163_v1, %v2163_v1 }
 0xa62   : > { %1536 = vadd.xlane.f32.xlu1 %v1535_v56 }
 0xa63   : > { %2060 = vmatmul.mubr.msk.bf16.vlgmr.msra.gmra.mxu0 %vm499_vm2, %v1539_v57 }
 0xaeb   : > { %v1537_v60 = vpop.xlane.xlu1 %1536 }
 0xaec   : > { %2164 = vrcp.f32 %v1537_v60 }
 0xaf9   : > { %v2165_v61 = vpop.eup %2164 }
 0xb23   : > { %v1580_v62 = vpop.f32.mrf.mxu0 }
 0xb24   : > { %v1586_v63 = vmul.f32 %v2165_v61, %v1580_v62 }
 0xb25   : > { %v2061_v0 = vpop.f32.mrf.mxu0 }
 0xb26   : > { %v1587_v2 = vpack.c.bf16 %v1586_v63, %v1586_v63 }
 0xb27   : > { %v1583_v3 = vpop.f32.mrf.mxu0 }
 0xb28   : > { %2066 = vmatmul.mubr.msk.bf16.vlgmr.msra.gmra.mxu1 %vm499_vm2, %v1587_v2 }
 0xb29   : > { %v2062_v4 = vpop.f32.mrf.mxu0 }
 0xbe8   : > { %v1628_v8 = vpop.f32.mrf.mxu1 }
 0xbe9   : > { %v1634_v9 = vadd.f32 %v1628_v8, %v1306_v32 }
 0xbea   : > { %v2067_v10 = vpop.f32.mrf.mxu1 }
 0xbeb   : > { %v1641_v11 = vadd.f32 %v1836_v7, %v1634_v9 }
 0xbec   : > { %v1631_v12 = vpop.f32.mrf.mxu1 }
 0xbed   : > { %1642 = vst.msk [vmem:[%s304_s19] sm:$0xff] %vm345_vm1, %v1641_v11 }
 0xbee   : > { %v2068_v13 = vpop.f32.mrf.mxu1 }
 0xbef   : > { %2179 = shalt.err (!%p2176_p5)
}
 0xbf0   : > { %s2180_s16 = scalar_lea.hbm %s2592_s23, 128  ;;  %s2184_s18 = scalar_lea.hbm %s2646_s7, 256 }
 0xbf1   : > { %p2181_p6 = scmp.ne.s32.totalorder %s2592_s23, %s2180_s16  ;;  %p2185_p10 = scmp.lt.s32.totalorder %s2592_s23, %s2646_s7 }
 0xbf2   : > { %p2186_p11 = scmp.lt.s32.totalorder %s2184_s18, %s2180_s16 }
 0xbf3   : > { %p2182_p7 = pnand %p2181_p6, %p2327_p4 }
 0xbf4   : > { %p2187_p12 = por %p2186_p11, %p2185_p10 }
 0xbf5   : > { %p2183_p9 = pneg %p2182_p7 }
 0xbf7   : > { %p2188_p13 = pnand %p2187_p12, %p2183_p9 }
 0xbf9   : > { %2191 = shalt.err (!%p2188_p13)
}
 0xbfa   : > { %2069 = dma.vmem_to_hbm [thread:$0]  (%p2327_p4), %s2594_s20, 128, %s2592_s23, %s1644_s27  }
 0xbfb PF: > { %p2075_p0 = scmp.ge.s32.totalorder %s2242_s29, 2  ;;  %s1670_s22 = sand.u32 1, %s2222_s24  }
 0xbfc   : > { %s1671_s30 = scalar_lea.sflag [#allocation3], %s1670_s22 }
 0xbfd   : > { %p2072_p1 = pnand %p2075_p0, %p2334_p8 }
 0xbff   : > { %p2073_p2 = pneg %p2072_p1 }
 0xc01   : > { %2217 = dma.done.wait (%p2073_p2), %s1671_s30, 128  }
 0xc02   : > { %2219 = vsyncadd (%p2073_p2), %s1671_s30, 4294967168  ;;  %s20_s29 = sadd.s32 1, %s2242_s29   ;;  %s2649_s24 = smov %s2226_s25 }
 0xc03   : > { %p17_p3 = scmp.ge.s32.totalorder %s20_s29, 4   ;;  %s2650_s25 = smov %s2230_s26 }
 0xc04   : > { %s2651_s26 = smov %s2340_s14  ;;  %s2652_s27 = smov %s2238_s28 }
 0xc05   : > { %s2653_s28 = smov %s2655_s9  ;;  %19 = sbr.rel (!%p17_p3) target bundleno = 4 (0x4), region = 98 }
 0xc0a   :  { %1676 = vsyncpa [#allocation3], 1 }
 0xc0b   :  { %1678 = vsyncpa [#allocation3 + $0x1], 1 }

</bundles_post_ra>
